<compile_context>
chip_gen: v5e
topology: v5e:2x2
jax: 0.10.0
libtpu: 0.0.40
codegen_flags: <defaults>
</compile_context>

<pallas_src>
import functools

import jax
import jax.numpy as jnp
from jax.experimental import pallas as pl
from jax.experimental.pallas import tpu as pltpu


def _layernorm_kernel(x_ref, g_ref, b_ref, o_ref, *, eps):
    # x_ref: (tm, D) tile; g_ref / b_ref: (1, D) broadcast params.
    x = x_ref[...].astype(jnp.float32)
    d = x.shape[-1]

    # Two-pass statistics on the resident tile (VPU/XLU slack is large in this
    # mem-bound kernel, so the second reduce pass is free).
    mean = jnp.sum(x, axis=-1, keepdims=True) * (1.0 / d)
    xc = x - mean
    # Unbiased variance (Bessel, ddof=1) — matches torch.Tensor.var default
    # used by the bygram module.
    var = jnp.sum(xc * xc, axis=-1, keepdims=True) * (1.0 / (d - 1))

    xhat = xc * jax.lax.rsqrt(var + eps)            # rsqrt -> EUP slot
    out = g_ref[...].astype(jnp.float32) * xhat + b_ref[...].astype(jnp.float32)
    o_ref[...] = out.astype(o_ref.dtype)


def _vmem_capacity_bytes():
    """Per-core VMEM capacity; chip-aware fallback if get_tpu_info is unavailable."""
    try:
        return int(pltpu.get_tpu_info().vmem_capacity_bytes)
    except Exception:
        try:
            kind = jax.devices()[0].device_kind.lower()
        except Exception:
            kind = ""
        if "v5" in kind or "v6" in kind:
            return 128 * 1024 * 1024     # v5e / v6e
        return 64 * 1024 * 1024          # v7x per-TC (conservative default)


def _auto_row_tile(n, d, itemsize, pack, vmem_cap, min_steps=8):
    """Row tile sized against VMEM (incl. f32 working set) and a minimum grid length."""
    # Budget: double-buffered in+out pipeline tiles (4*d*itemsize per row) plus
    # the in-kernel f32 working set (~2 live (tm, D) f32 arrays => 8*d per row).
    budget = int(vmem_cap * 0.4)
    per_row = 4 * d * itemsize + 8 * d
    tm_budget = budget // max(per_row, 1)
    tm_budget = min(tm_budget, 1024)                      # diminishing returns
    tm_budget = max(pack, (tm_budget // pack) * pack)

    # Keep the grid >= min_steps (when N allows) so the pipeline has an i+1
    # block to prefetch and v7x can shard rows across both TensorCores.
    # min_steps is even, so large-N grids land on an even step count.
    tm_steps = pl.cdiv(n, min_steps)
    tm_steps = max(pack, (tm_steps // pack) * pack)

    return max(pack, min(tm_budget, tm_steps))


def layernorm(x, gamma, beta, *, eps=1e-5, tm=None):
    """x: (N, D) float array; gamma, beta: (D,). Normalizes over dim 1 (ddof=1)."""
    n, d = x.shape
    assert d > 1, "LayerNorm over a single feature is degenerate (ddof=1)"
    # NOTE: D is kept whole per tile (required by the row reduction). If
    # D % 128 != 0 the kernel is still correct but output stores are masked
    # (vst.msk); model dims should be lane-dense for best throughput.

    itemsize = jnp.dtype(x.dtype).itemsize
    pack = max(8, 32 // itemsize)             # sublane packing: 8 f32, 16 bf16
    vmem_cap = _vmem_capacity_bytes()

    if tm is None:
        tm = _auto_row_tile(n, d, itemsize, pack, vmem_cap)
    else:
        tm = max(pack, (tm // pack) * pack)

    grid_steps = pl.cdiv(n, tm)               # boundary block masked by Pallas

    g2 = gamma.reshape(1, d)
    b2 = beta.reshape(1, d)

    # Scoped VMEM: double-buffered x/out tiles + f32 working set + params.
    needed = (4 * tm * d * itemsize            # 2 bufs x (x tile + out tile)
              + 2 * tm * d * 4                 # f32 upcast + one live temp
              + 4 * d * (itemsize + 4))        # gamma/beta (double-buffered)
    vmem_limit = max(32 << 20, needed + (4 << 20))
    if vmem_limit > int(vmem_cap * 0.9):
        raise ValueError(
            f"LayerNorm tile (tm={tm}, D={d}) needs ~{vmem_limit} bytes of VMEM "
            f"but only {vmem_cap} bytes are available; reduce tm.")

    kernel = functools.partial(_layernorm_kernel, eps=eps)

    out = pl.pallas_call(
        kernel,
        out_shape=jax.ShapeDtypeStruct((n, d), x.dtype),
        grid_spec=pltpu.PrefetchScalarGridSpec(
            num_scalar_prefetch=0,
            grid=(grid_steps,),
            in_specs=[
                pl.BlockSpec((tm, d), lambda i: (i, 0)),   # x row tile
                pl.BlockSpec((1, d), lambda i: (0, 0)),    # gamma (broadcast)
                pl.BlockSpec((1, d), lambda i: (0, 0)),    # beta  (broadcast)
            ],
            out_specs=pl.BlockSpec((tm, d), lambda i: (i, 0)),
        ),
        compiler_params=pltpu.CompilerParams(
            dimension_semantics=("parallel",),   # shards row blocks across TCs (v7x)
            vmem_limit_bytes=int(vmem_limit),
        ),
    )(x, g2, b2)

    return out


def layernorm_ref(x, gamma, beta, eps=1e-5):
    mean = jnp.mean(x, axis=1, keepdims=True)
    var = jnp.var(x, axis=1, keepdims=True, ddof=1)  # unbiased, like torch.Tensor.var
    xhat = (x - mean) / jnp.sqrt(var + eps)
    return gamma * xhat + beta


if __name__ == "__main__":
    key = jax.random.PRNGKey(0)
    k1, k2 = jax.random.split(key)

    # Case 1: tile-aligned rows, lane-dense D (activation slab (N, hidden)).
    N, D = 16, 128
    x = jax.random.normal(k1, (N, D), dtype=jnp.float32)
    gamma = jnp.ones((D,), dtype=jnp.float32)   # module __init__: ones / zeros
    beta = jnp.zeros((D,), dtype=jnp.float32)

    out = jax.block_until_ready(layernorm(x, gamma, beta, eps=1e-5))
    ref = layernorm_ref(x, gamma, beta, eps=1e-5)
    assert out.shape == (N, D)
    assert jnp.allclose(out, ref, atol=1e-5, rtol=1e-5)

    # Case 2: ragged row count (exercises the masked boundary block — no host pad).
    N2, D2 = 10, 256
    x2 = jax.random.normal(k2, (N2, D2), dtype=jnp.float32)
    g2 = jnp.ones((D2,), dtype=jnp.float32)
    b2 = jnp.zeros((D2,), dtype=jnp.float32)

    out2 = jax.block_until_ready(layernorm(x2, g2, b2, eps=1e-5))
    ref2 = layernorm_ref(x2, g2, b2, eps=1e-5)
    assert out2.shape == (N2, D2)
    assert jnp.allclose(out2, ref2, atol=1e-5, rtol=1e-5)

    print("KERNEL_OK")
</pallas_src>

<mosaic_0001>
module attributes {stable_mosaic.version = 11 : i64} {
  func.func @_layernorm_kernel(%arg0: i32, %arg1: memref<8x128xf32, #tpu.memory_space<vmem>>, %arg2: memref<1x128xf32, #tpu.memory_space<vmem>>, %arg3: memref<1x128xf32, #tpu.memory_space<vmem>>, %arg4: memref<8x128xf32, #tpu.memory_space<vmem>>) attributes {dimension_semantics = [#tpu.dimension_semantics<parallel>], iteration_bounds = array<i64: 2>, scalar_prefetch = 0 : i64, scratch_operands = 0 : i64, tpu.core_type = #tpu.core_type<tc>, window_params = [{transform_indices = @transform_0, window_bounds = array<i64: 8, 128>}, {pipeline_mode = #tpu.pipeline_mode<synchronous>, transform_indices = @transform_1, window_bounds = array<i64: 1, 128>}, {pipeline_mode = #tpu.pipeline_mode<synchronous>, transform_indices = @transform_2, window_bounds = array<i64: 1, 128>}, {transform_indices = @transform_3, window_bounds = array<i64: 8, 128>}]} {
    %c0 = arith.constant 0 : index
    %c0_0 = arith.constant 0 : index
    %0 = vector.load %arg1[%c0, %c0_0] : memref<8x128xf32, #tpu.memory_space<vmem>>, vector<8x128xf32>
    %cst = arith.constant dense<0.000000e+00> : vector<8xf32>
    %1 = vector.multi_reduction <add>, %0, %cst [1] : vector<8x128xf32> to vector<8xf32>
    %2 = vector.shape_cast %1 : vector<8xf32> to vector<8x1xf32>
    %cst_1 = arith.constant 7.812500e-03 : f32
    %3 = vector.broadcast %cst_1 : f32 to vector<8x1xf32>
    %4 = arith.mulf %2, %3 : vector<8x1xf32>
    %5 = vector.broadcast %4 : vector<8x1xf32> to vector<8x128xf32>
    %6 = arith.subf %0, %5 : vector<8x128xf32>
    %7 = arith.mulf %6, %6 : vector<8x128xf32>
    %cst_2 = arith.constant dense<0.000000e+00> : vector<8xf32>
    %8 = vector.multi_reduction <add>, %7, %cst_2 [1] : vector<8x128xf32> to vector<8xf32>
    %9 = vector.shape_cast %8 : vector<8xf32> to vector<8x1xf32>
    %cst_3 = arith.constant 0.00787401571 : f32
    %10 = vector.broadcast %cst_3 : f32 to vector<8x1xf32>
    %11 = arith.mulf %9, %10 : vector<8x1xf32>
    %cst_4 = arith.constant 9.99999974E-6 : f32
    %12 = vector.broadcast %cst_4 : f32 to vector<8x1xf32>
    %13 = arith.addf %11, %12 : vector<8x1xf32>
    %14 = math.rsqrt %13 : vector<8x1xf32>
    %15 = vector.broadcast %14 : vector<8x1xf32> to vector<8x128xf32>
    %16 = arith.mulf %6, %15 : vector<8x128xf32>
    %c0_5 = arith.constant 0 : index
    %c0_6 = arith.constant 0 : index
    %17 = vector.load %arg2[%c0_5, %c0_6] : memref<1x128xf32, #tpu.memory_space<vmem>>, vector<1x128xf32>
    %18 = vector.broadcast %17 : vector<1x128xf32> to vector<8x128xf32>
    %19 = arith.mulf %18, %16 : vector<8x128xf32>
    %c0_7 = arith.constant 0 : index
    %c0_8 = arith.constant 0 : index
    %20 = vector.load %arg3[%c0_7, %c0_8] : memref<1x128xf32, #tpu.memory_space<vmem>>, vector<1x128xf32>
    %21 = vector.broadcast %20 : vector<1x128xf32> to vector<8x128xf32>
    %22 = arith.addf %19, %21 : vector<8x128xf32>
    %c0_9 = arith.constant 0 : index
    %c0_10 = arith.constant 0 : index
    %23 = vector.load %arg4[%c0_9, %c0_10] : memref<8x128xf32, #tpu.memory_space<vmem>>, vector<8x128xf32>
    tpu.vector_store %arg4[%c0_9, %c0_10], %22 {strides = array<i32>} : memref<8x128xf32, #tpu.memory_space<vmem>>, vector<8x128xf32>,
    return
  }
  func.func @transform_0(%arg0: i32) -> (i32, i32) {
    %c0_i32 = arith.constant 0 : i32
    %c0_i32_0 = arith.constant 0 : i32
    return %arg0, %c0_i32 : i32, i32
  }
  func.func @transform_1(%arg0: i32) -> (i32, i32) {
    %c0_i32 = arith.constant 0 : i32
    %c0_i32_0 = arith.constant 0 : i32
    %c0_i32_1 = arith.constant 0 : i32
    return %c0_i32, %c0_i32_0 : i32, i32
  }
  func.func @transform_2(%arg0: i32) -> (i32, i32) {
    %c0_i32 = arith.constant 0 : i32
    %c0_i32_0 = arith.constant 0 : i32
    %c0_i32_1 = arith.constant 0 : i32
    return %c0_i32, %c0_i32_0 : i32, i32
  }
  func.func @transform_3(%arg0: i32) -> (i32, i32) {
    %c0_i32 = arith.constant 0 : i32
    %c0_i32_0 = arith.constant 0 : i32
    return %arg0, %c0_i32 : i32, i32
  }
}

</mosaic_0001>

<bundles_post_ra>
// kernel: tpu_custom_call.1
= control target key start
LH: loop header
LB: loop body
LE: loop exit
PB: predicated region body
PF: predicated region fallthrough
CT: control target
= control target key end

     0   :  { %8 = vsyncpa [#allocation3], 0  ;;  %s704_s0 = inlined_call_operand.hbm [shape: f32[16,128], index: 0, kind: input, shape index: {}]   ;;  %s705_s1 = inlined_call_operand.hbm [shape: f32[1,128], index: 1, kind: input, shape index: {}]   ;;  %s706_s2 = inlined_call_operand.vmem [shape: f32[1,128], index: 2, kind: input, shape index: {}]   ;;  %s707_s3 = inlined_call_operand.hbm [shape: f32[16,128], index: 3, kind: output, shape index: {}]  }
   0x1   :  { %10 = vsyncpa [#allocation3 + $0x1], 0 }
   0x2   :  { %11 = vsyncpa [#allocation6], 0 }
   0x3   :  { %12 = vsyncpa [#allocation4], 0 }
   0x4   :  { %14 = vsyncpa [#allocation4 + $0x1], 0  ;;  %s559_s12 = smov 0   ;;  %s561_s13 = smov 0  }
   0x5   :  { %s563_s14 = smov 0   ;;  %s565_s15 = smov 0  }
   0x6 LB: > { %s580_s16 = sadd.s32 4294967295, %s536_s15   ;;  %s331_s17 = sadd.s32 4294967294, %s536_s15   ;;  %s536_s15 = sphi %s565_s15, %s717_s15   ;;  %s532_s14 = sphi %s563_s14, %s716_s14   ;;  %s528_s13 = sphi %s561_s13, %s715_s13   ;;  %s524_s12 = sphi %s559_s12, %s714_s12  }
   0x7   : > { %p40_p0 = scmp.ne.s32.totalorder %s528_s13, %s524_s12  ;;  %p41_p1 = scmp.eq.s32.totalorder %s580_s16, 0 }
   0x8   : > { %p106_p2 = scmp.eq.s32.totalorder %s580_s16, 1  ;;  %p112_p3 = scmp.eq.s32.totalorder %s331_s17, 1 }
   0x9   : > { %p589_p4 = por %p41_p1, %p40_p0  ;;  %p332_p5 = scmp.ge.s32.totalorder %s536_s15, 1 }
   0xa   : > { %p594_p6 = por %p112_p3, %p40_p0  ;;  %p119_p7 = scmp.lt.s32.totalorder %s536_s15, 3 }
   0xb   : > { %s131_s22 = sshll.u32 %s705_s1, 4  ;;  %s538_s24 = smov [#allocation5]   ;;  %s132_s22 = int_to_ptr.hbm [resolvable:$true] %s131_s22 }
   0xc   : > { %p602_p8 = pnand %p332_p5, %p119_p7  ;;  %s133_s25 = sshll.u32 %s538_s24, 4  ;;  %s134_s25 = int_to_ptr.vmem [resolvable:$true] %s133_s25 }
   0xd   : > { %s612_s26 = sadd.s32 1, %s536_s15   ;;  %s27_s27 = sadd.s32 1, %s532_s14 }
   0xe   : > { %p353_p10 = pneg %p602_p8  ;;  %s24_s28 = ssub.s32 %s536_s15, %s612_s26 }
   0xf   : > { %p25_p12 = scmp.eq.s32.totalorder %s24_s28, 0  ;;  %p34_p13 = scmp.ne.s32.totalorder %s532_s14, %s528_s13 }
  0x10   : > { %p354_p11 = pnand %p353_p10, %p41_p1  ;;  %p35_p0 = scmp.eq.s32.totalorder %s536_s15, 0 }
  0x11   : > { %s621_s29 = scalar_select %p25_p12, %s532_s14, %s27_s27  }
  0x12   : > { %356 = dma.hbm_to_vmem [thread:$0]  (!%p354_p11), %s132_s22, 16, %s134_s25, [#allocation6]  }
  0x13   : > { %p625_p3 = por %p106_p2, %p34_p13  ;;  %p366_p5 = scmp.lt.s32.totalorder %s536_s15, 2 }
  0x14   : > { %s147_s4 = sand.u32 1, %s532_s14   ;;  %s336_s5 = sshll.u32 %s536_s15, 3 }
  0x15   : > { %p36_p7 = por %p35_p0, %p34_p13  ;;  %s335_s6 = sshll.u32 %s147_s4, 3 }
  0x16   : > { %s155_s9 = scalar_lea.hbm %s704_s0, %s336_s5  ;;  %s151_s11 = scalar_lea.vmem [#allocation2], %s335_s6 }
  0x17   : > { %s157_s10 = sshll.u32 %s155_s9, 4  ;;  %s159_s17 = sshll.u32 %s151_s11, 4  ;;  %s158_s10 = int_to_ptr.hbm [resolvable:$true] %s157_s10  ;;  %s160_s17 = int_to_ptr.vmem [resolvable:$true] %s159_s17 }
  0x18   : > { %p635_p10 = pnand %p366_p5, %p36_p7  ;;  %s148_s21 = scalar_lea.sflag [#allocation3], %s147_s4 }
  0x19   : > { %s436_s22 = sshra.s32 %s158_s10, 4  ;;  %s443_s28 = scalar_lea.hbm %s704_s0, 16  ;;  %s437_s22 = int_to_ptr.hbm [resolvable:$true] %s436_s22 }
  0x1a   : > { %s438_s24 = scalar_lea.hbm %s437_s22, 8  ;;  %p440_p11 = pneg %p635_p10 }
  0x1b   : > { %p439_p2 = scmp.ne.s32.totalorder %s437_s22, %s438_s24  ;;  %p444_p0 = scmp.lt.s32.totalorder %s437_s22, %s704_s0 }
  0x1c   : > { %p445_p5 = scmp.lt.s32.totalorder %s443_s28, %s438_s24 }
  0x1d   : > { %p441_p12 = pnand %p440_p11, %p439_p2 }
  0x1e   : > { %p446_p7 = por %p445_p5, %p444_p0 }
  0x1f   : > { %p442_p13 = pneg %p441_p12 }
  0x21   : > { %p447_p9 = pnand %p446_p7, %p442_p13 }
  0x23   : > { %450 = shalt.err (!%p447_p9)
}
  0x24   : > { %360 = dma.hbm_to_vmem [thread:$0]  (!%p635_p10), %s158_s10, 128, %s160_s17, %s148_s21  }
  0x25   : > { %168 = sbr.rel (%p602_p8) target bundleno = 315 (0x13b), region = 32  ;;  %s652_s4 = sand.u32 (!%p602_p8), 1, %s528_s13  }
  0x26   : > { %s338_s7 = sshll.u32 (!%p602_p8), %s652_s4, 3  ;;  %s171_s8 = scalar_lea.sflag (!%p602_p8), [#allocation3], %s652_s4 }
  0x27   : > { %s174_s9 = scalar_lea.vmem (!%p602_p8), [#allocation2], %s338_s7 }
  0x2a   : > { %511 = dma.done.wait (%p589_p4), %s171_s8, 128  }
  0x2b   : > { %513 = vsyncadd (%p589_p4), %s171_s8, 4294967168 }
  0x2c   : > { %515 = dma.done.wait (%p41_p1), [#allocation6], 16  }
  0x2d   : > { %517 = vsyncadd (%p41_p1), [#allocation6], 4294967280  ;;  %v203_v0 = vld [vmem:[%s174_s9] sm:$0xff]  ;;  %s342_s18 = sshll.u32 %s580_s16, 3  ;;  %v402_v14 = vld [vmem:[#allocation5] ss:$0 sm:$0xff] }
  0x2e   : > { %204 = vadd.xlane.f32.xlu0 %v203_v0  ;;  %s246_s11 = scalar_lea.hbm %s707_s3, %s342_s18  ;;  %v403_v17 = vld [vmem:[%s706_s2] ss:$0 sm:$0xff]  ;;  %s202_s21 = scalar_lea.vmem [#allocation7], %s338_s7 }
  0x2f   : > { %s248_s22 = sshll.u32 %s202_s21, 4  ;;  %s250_s16 = sshll.u32 %s246_s11, 4  ;;  %s249_s22 = int_to_ptr.vmem [resolvable:$true] %s248_s22  ;;  %s251_s16 = int_to_ptr.hbm [resolvable:$true] %s250_s16 }
  0x30   : > { %s236_s24 = scalar_lea.sflag [#allocation4], %s652_s4  ;;  %s480_s25 = sshra.s32 %s251_s16, 4  ;;  %s481_s25 = int_to_ptr.hbm [resolvable:$true] %s480_s25 }
  0x31   : > { %s482_s27 = scalar_lea.hbm %s481_s25, 8  ;;  %s486_s6 = scalar_lea.hbm %s707_s3, 16 }
  0x32   : > { %p483_p1 = scmp.ne.s32.totalorder %s481_s25, %s482_s27  ;;  %p487_p9 = scmp.lt.s32.totalorder %s481_s25, %s707_s3 }
  0x33   : > { %p488_p10 = scmp.lt.s32.totalorder %s486_s6, %s482_s27 }
  0x34   : > { %p484_p4 = pnand %p483_p1, %p625_p3 }
  0x35   : > { %p489_p2 = por %p488_p10, %p487_p9 }
  0x36   : > { %p485_p8 = pneg %p484_p4 }
  0x38   : > { %p490_p11 = pnand %p489_p2, %p485_p8 }
  0xa1   : > { %v205_v1 = vpop.xlane.xlu0 %204 }
  0xa2   : > { %v206_v2 = vmul.f32 0.0078125, %v205_v1 }
  0xa4   : > { %v207_v3 = vsub.f32 %v203_v0, %v206_v2 }
  0xa6   : > { %v208_v4 = vmul.f32 %v207_v3, %v207_v3 }
  0xa8   : > { %209 = vadd.xlane.f32.xlu0 %v208_v4 }
 0x11b   : > { %v210_v5 = vpop.xlane.xlu0 %209 }
 0x11c   : > { %v211_v6 = vmul.f32 0.007874016, %v210_v5 }
 0x11e   : > { %v212_v7 = vadd.f32 1e-05, %v211_v6 }
 0x120   : > { %404 = vrsqrt.f32 %v212_v7  ;;  %vm219_vm1 = vweird.f32 %v212_v7 }
 0x126   : > { %v405_v8 = vpop.eup %404 }
 0x127   : > { %v214_v9 = vmul.f32 %v405_v8, %v212_v7  ;;  %vm220_vm0 = vweird.f32 %v405_v8 }
 0x128   : > { %vm221_vm2 = vmor %vm219_vm1, %vm220_vm0 }
 0x129   : > { %v215_v10 = vmul.f32 %v405_v8, %v214_v9 }
 0x12b   : > { %v216_v11 = vmul.f32 0.5, %v215_v10 }
 0x12d   : > { %v217_v12 = vsub.f32 1.5, %v216_v11 }
 0x12f   : > { %v218_v13 = vmul.f32 %v405_v8, %v217_v12 }
 0x131   : > { %v222_v15 = vsel %vm221_vm2, %v405_v8, %v218_v13 }
 0x132   : > { %v223_v16 = vmul.f32 %v222_v15, %v207_v3 }
 0x134   : > { %v228_v18 = vmul.f32 %v402_v14, %v223_v16 }
 0x136   : > { %v233_v19 = vadd.f32 %v403_v17, %v228_v18 }
 0x138   : > { %234 = vst [vmem:[%s202_s21] sm:$0xff] %v233_v19 }
 0x139   : > { %493 = shalt.err (!%p490_p11)
}
 0x13a   : > { %351 = dma.vmem_to_hbm [thread:$0]  (%p625_p3), %s249_s22, 128, %s251_s16, %s236_s24  }
 0x13b PF: > { %s262_s4 = sand.u32 1, %s524_s12   ;;  %p713_p12 = scmp.ge.s32.totalorder %s536_s15, 2 }
 0x13c   : > { %s263_s9 = scalar_lea.sflag [#allocation4], %s262_s4 }
 0x13d   : > { %p362_p13 = pnand %p713_p12, %p594_p6 }
 0x13f   : > { %p363_p0 = pneg %p362_p13 }
 0x141   : > { %519 = dma.done.wait (%p363_p0), %s263_s9, 128  }
 0x142   : > { %521 = vsyncadd (%p363_p0), %s263_s9, 4294967168  ;;  %p17_p5 = scmp.ge.s32.totalorder %s612_s26, 4   ;;  %s714_s12 = smov %s528_s13 }
 0x143   : > { %s715_s13 = smov %s532_s14  ;;  %s716_s14 = smov %s621_s29 }
 0x144   : > { %s717_s15 = smov %s612_s26  ;;  %19 = sbr.rel (!%p17_p5) target bundleno = 6 (0x6), region = 81 }
 0x149   :  { %269 = vsyncpa [#allocation3], 1 }
 0x14a   :  { %271 = vsyncpa [#allocation3 + $0x1], 1 }
 0x14b   :  { %272 = vsyncpa [#allocation6], 1 }
 0x14c   :  { %273 = vsyncpa [#allocation4], 1 }
 0x14d   :  { %275 = vsyncpa [#allocation4 + $0x1], 1 }

</bundles_post_ra>
